<compile_context>
chip_gen: v7x
topology: tpu7x:2x2x1
jax: 0.10.0
libtpu: 0.0.40
codegen_flags: <defaults>
</compile_context>

<pallas_src>
import jax
import jax.numpy as jnp
from jax.experimental import pallas as pl
from jax.experimental.pallas import tpu as pltpu

EPS = 1e-5


def _cdiv(a, b):
    return (a + b - 1) // b


def _round_up(n, m):
    return _cdiv(n, m) * m


# ----------------------------------------------------------------------------
# Kernel: 5 matmul(+ReLU) stages on the MXU; BN already folded into weights.
# ----------------------------------------------------------------------------
def simplenet_kernel(x_ref, w_in_ref, w_hid_ref, w_out_ref, b_ref, out_ref, hid_ref):
    H = w_in_ref.shape[1]
    O = w_out_ref.shape[1]
    b = b_ref[...]  # (5, max(H, O)) packed biases

    def stage(h, w, bias):
        return jnp.maximum(
            jnp.dot(h, w, preferred_element_type=jnp.float32) + bias, 0.0)

    out1 = stage(x_ref[...], w_in_ref[...], b[0:1, :H])
    out2 = stage(out1, w_hid_ref[0], b[1:2, :H])
    out3 = stage(out2, w_hid_ref[1], b[2:3, :H])
    out4 = stage(out3, w_hid_ref[2], b[3:4, :H])

    # Single lane-dense store of all returned intermediate activations (TB, 4*H).
    hid_ref[...] = jnp.concatenate([out1, out2, out3, out4], axis=-1)
    # Final layer: unpadded (TB, O) store (masked vst is fine; HBM bytes are what bind).
    out_ref[...] = (jnp.dot(out4, w_out_ref[...], preferred_element_type=jnp.float32)
                    + b[4:5, :O])


# ----------------------------------------------------------------------------
# Wrapper: BN folding, operand packing, batch tiling.
# ----------------------------------------------------------------------------
def _fold_bn_into_linear(w, b, gamma, beta, mean, var):
    """Fold  z = BN(h) @ w + b  into  z = h @ w' + b'  (inference-mode BN)."""
    scale = gamma * jax.lax.rsqrt(var + EPS)      # (H,)
    shift = beta - mean * scale                   # (H,)
    w_f = scale[:, None] * w                      # (H, N)
    b_f = b + shift @ w                           # (1, N)
    return w_f, b_f


def simplenet_forward(x, params, *, tb_max=512):
    B, I = x.shape
    H = params["w_in"].shape[1]
    O = params["w_out"].shape[1]

    # --- Fold each BatchNorm (applied after out_k) into the *next* Linear. ---
    w1, b1 = _fold_bn_into_linear(
        params["w1"], params["b1"],
        params["bn_gamma"][0], params["bn_beta"][0],
        params["bn_mean"][0], params["bn_var"][0])
    w2, b2 = _fold_bn_into_linear(
        params["w2"], params["b2"],
        params["bn_gamma"][1], params["bn_beta"][1],
        params["bn_mean"][1], params["bn_var"][1])
    w3, b3 = _fold_bn_into_linear(
        params["w3"], params["b3"],
        params["bn_gamma"][2], params["bn_beta"][2],
        params["bn_mean"][2], params["bn_var"][2])
    w_out, b_out = _fold_bn_into_linear(
        params["w_out"], params["b_out"],
        params["bn_gamma"][3], params["bn_beta"][3],
        params["bn_mean"][3], params["bn_var"][3])

    # --- Pack tiny operands: 3 hidden weights -> (3,H,H); 5 biases -> (5, HB). ---
    HB = max(H, O)

    def _pad_bias(bias):
        return jnp.pad(bias, ((0, 0), (0, HB - bias.shape[1])))

    b_pack = jnp.concatenate(
        [_pad_bias(params["b_in"]), _pad_bias(b1), _pad_bias(b2),
         _pad_bias(b3), _pad_bias(b_out)], axis=0)           # (5, HB)
    w_hid = jnp.stack([w1, w2, w3], axis=0)                  # (3, H, H)

    # --- Batch tiling: tail-balanced TB; >= 2 grid steps for large B (v7x megacore). ---
    n_steps = _cdiv(B, tb_max)
    if B >= 256:
        n_steps = max(n_steps, 2)
    TB = _round_up(_cdiv(B, n_steps), 8)
    B_pad = n_steps * TB
    if B_pad != B:
        x = jnp.pad(x, ((0, B_pad - B), (0, 0)))

    batch_map = lambda i: (i, 0)          # tile along batch
    in_specs = [
        pl.BlockSpec((TB, I), batch_map),
        pl.BlockSpec((I, H), lambda i: (0, 0)),        # weights resident across steps
        pl.BlockSpec((3, H, H), lambda i: (0, 0, 0)),
        pl.BlockSpec((H, O), lambda i: (0, 0)),
        pl.BlockSpec((5, HB), lambda i: (0, 0)),
    ]
    out_specs = (
        pl.BlockSpec((TB, O), batch_map),              # unpadded -> no write amplification
        pl.BlockSpec((TB, 4 * H), batch_map),          # lane-dense at H=32 (4*H=128)
    )
    out_shapes = (
        jax.ShapeDtypeStruct((B_pad, O), jnp.float32),
        jax.ShapeDtypeStruct((B_pad, 4 * H), jnp.float32),
    )

    out_p, hid = pl.pallas_call(
        simplenet_kernel,
        out_shape=out_shapes,
        grid=(n_steps,),
        in_specs=in_specs,
        out_specs=out_specs,
        compiler_params=pltpu.CompilerParams(
            dimension_semantics=("parallel",)),
    )(x, params["w_in"], w_hid, w_out, b_pack)

    out = out_p[:B]
    out1 = hid[:B, 0 * H:1 * H]
    out2 = hid[:B, 1 * H:2 * H]
    out3 = hid[:B, 2 * H:3 * H]
    out4 = hid[:B, 3 * H:4 * H]
    return out, (out1, out2, out3, out4)


# ----------------------------------------------------------------------------
# Parameter construction & pure-JAX reference (unfolded BN) for verification.
# ----------------------------------------------------------------------------
def make_params(key, input_size, hidden_size, output_size):
    ks = jax.random.split(key, 16)

    def linear_init(kw, kb, fan_in, fan_out):
        bound = 1.0 / jnp.sqrt(fan_in)
        # stored as (in, out): x @ W + b   (PyTorch weight is (out, in), y = x W^T + b)
        w = jax.random.uniform(kw, (fan_in, fan_out), jnp.float32, -bound, bound)
        b = jax.random.uniform(kb, (1, fan_out), jnp.float32, -bound, bound)
        return w, b

    w_in, b_in = linear_init(ks[0], ks[1], input_size, hidden_size)
    w1, b1 = linear_init(ks[2], ks[3], hidden_size, hidden_size)
    w2, b2 = linear_init(ks[4], ks[5], hidden_size, hidden_size)
    w3, b3 = linear_init(ks[6], ks[7], hidden_size, hidden_size)
    w_out, b_out = linear_init(ks[8], ks[9], hidden_size, output_size)

    bn_gamma = 1.0 + 0.1 * jax.random.normal(ks[10], (4, hidden_size), jnp.float32)
    bn_beta = 0.1 * jax.random.normal(ks[11], (4, hidden_size), jnp.float32)
    bn_mean = 0.1 * jax.random.normal(ks[12], (4, hidden_size), jnp.float32)
    bn_var = jax.random.uniform(ks[13], (4, hidden_size), jnp.float32, 0.5, 1.5)

    return dict(
        w_in=w_in, b_in=b_in, w1=w1, b1=b1, w2=w2, b2=b2, w3=w3, b3=b3,
        w_out=w_out, b_out=b_out,
        bn_gamma=bn_gamma, bn_beta=bn_beta, bn_mean=bn_mean, bn_var=bn_var,
    )


def reference_forward(x, p):
    def bn(h, i):
        return ((h - p["bn_mean"][i]) / jnp.sqrt(p["bn_var"][i] + EPS)
                * p["bn_gamma"][i] + p["bn_beta"][i])

    out1 = jnp.maximum(x @ p["w_in"] + p["b_in"], 0.0)
    h = bn(out1, 0)
    out2 = jnp.maximum(h @ p["w1"] + p["b1"], 0.0)
    h = bn(out2, 1)
    out3 = jnp.maximum(h @ p["w2"] + p["b2"], 0.0)
    h = bn(out3, 2)
    out4 = jnp.maximum(h @ p["w3"] + p["b3"], 0.0)
    h = bn(out4, 3)
    out = h @ p["w_out"] + p["b_out"]
    return out, (out1, out2, out3, out4)


def _check(x, params):
    out, hids = simplenet_forward(x, params)
    jax.block_until_ready((out,) + hids)
    ref_out, ref_hids = reference_forward(x, params)
    for a, b in [(out, ref_out)] + list(zip(hids, ref_hids)):
        assert a.shape == b.shape, "shape mismatch vs JAX reference"
        assert jnp.allclose(a, b, atol=1e-4, rtol=1e-4), "mismatch vs JAX reference"


if __name__ == "__main__":
    input_size, hidden_size, output_size = 16, 32, 8
    key = jax.random.PRNGKey(0)
    kx, kp, kx2 = jax.random.split(key, 3)
    params = make_params(kp, input_size, hidden_size, output_size)

    # Small shape matching the module demo (single grid step).
    x_small = jax.random.normal(kx, (8, input_size), jnp.float32)
    _check(x_small, params)

    # Exercise the multi-step ("parallel") grid + tail-padding path.
    x_big = jax.random.normal(kx2, (260, input_size), jnp.float32)
    _check(x_big, params)

    print("KERNEL_OK")
</pallas_src>

<mosaic_0001>
module attributes {stable_mosaic.version = 11 : i64} {
  func.func @simplenet_kernel(%arg0: i32, %arg1: memref<8x16xf32, #tpu.memory_space<vmem>>, %arg2: memref<16x32xf32, #tpu.memory_space<vmem>>, %arg3: memref<3x32x32xf32, #tpu.memory_space<vmem>>, %arg4: memref<32x8xf32, #tpu.memory_space<vmem>>, %arg5: memref<5x32xf32, #tpu.memory_space<vmem>>, %arg6: memref<8x8xf32, #tpu.memory_space<vmem>>, %arg7: memref<8x128xf32, #tpu.memory_space<vmem>>) attributes {dimension_semantics = [#tpu.dimension_semantics<parallel>], iteration_bounds = array<i64: 1>, scalar_prefetch = 0 : i64, scratch_operands = 0 : i64, tpu.core_type = #tpu.core_type<tc>, window_params = [{transform_indices = @transform_0, window_bounds = array<i64: 8, 16>}, {pipeline_mode = #tpu.pipeline_mode<synchronous>, transform_indices = @transform_1, window_bounds = array<i64: 16, 32>}, {pipeline_mode = #tpu.pipeline_mode<synchronous>, transform_indices = @transform_2, window_bounds = array<i64: 3, 32, 32>}, {pipeline_mode = #tpu.pipeline_mode<synchronous>, transform_indices = @transform_3, window_bounds = array<i64: 32, 8>}, {pipeline_mode = #tpu.pipeline_mode<synchronous>, transform_indices = @transform_4, window_bounds = array<i64: 5, 32>}, {transform_indices = @transform_5, window_bounds = array<i64: 8, 8>}, {transform_indices = @transform_6, window_bounds = array<i64: 8, 128>}]} {
    %c0 = arith.constant 0 : index
    %c0_0 = arith.constant 0 : index
    %0 = vector.load %arg5[%c0, %c0_0] : memref<5x32xf32, #tpu.memory_space<vmem>>, vector<5x32xf32>
    %c0_1 = arith.constant 0 : index
    %c0_2 = arith.constant 0 : index
    %1 = vector.load %arg1[%c0_1, %c0_2] : memref<8x16xf32, #tpu.memory_space<vmem>>, vector<8x16xf32>
    %c0_3 = arith.constant 0 : index
    %c0_4 = arith.constant 0 : index
    %2 = vector.load %arg2[%c0_3, %c0_4] : memref<16x32xf32, #tpu.memory_space<vmem>>, vector<16x32xf32>
    %3 = vector.extract_strided_slice %0 {offsets = [0, 0], sizes = [1, 32], strides = [1, 1]} : vector<5x32xf32> to vector<1x32xf32>
    %cst = arith.constant dense<0.000000e+00> : vector<8x32xf32>
    %4 = tpu.matmul %1, %2, %cst {dimension_numbers = #tpu.dot_dimension_numbers<[1], [0], [0], [1], [0, 0, 1, 1], [], []>} : vector<8x16xf32>, vector<16x32xf32>, vector<8x32xf32> -> vector<8x32xf32>
    %5 = vector.broadcast %3 : vector<1x32xf32> to vector<8x32xf32>
    %6 = arith.addf %4, %5 : vector<8x32xf32>
    %cst_5 = arith.constant 0.000000e+00 : f32
    %7 = vector.broadcast %cst_5 : f32 to vector<8x32xf32>
    %8 = arith.maximumf %6, %7 : vector<8x32xf32>
    %c0_6 = arith.constant 0 : index
    %c0_7 = arith.constant 0 : index
    %c0_8 = arith.constant 0 : index
    %9 = vector.load %arg3[%c0_6, %c0_7, %c0_8] : memref<3x32x32xf32, #tpu.memory_space<vmem>>, vector<1x32x32xf32>
    %10 = vector.shape_cast %9 : vector<1x32x32xf32> to vector<32x32xf32>
    %11 = vector.extract_strided_slice %0 {offsets = [1, 0], sizes = [1, 32], strides = [1, 1]} : vector<5x32xf32> to vector<1x32xf32>
    %cst_9 = arith.constant dense<0.000000e+00> : vector<8x32xf32>
    %12 = tpu.matmul %8, %10, %cst_9 {dimension_numbers = #tpu.dot_dimension_numbers<[1], [0], [0], [1], [0, 0, 1, 1], [], []>} : vector<8x32xf32>, vector<32x32xf32>, vector<8x32xf32> -> vector<8x32xf32>
    %13 = vector.broadcast %11 : vector<1x32xf32> to vector<8x32xf32>
    %14 = arith.addf %12, %13 : vector<8x32xf32>
    %cst_10 = arith.constant 0.000000e+00 : f32
    %15 = vector.broadcast %cst_10 : f32 to vector<8x32xf32>
    %16 = arith.maximumf %14, %15 : vector<8x32xf32>
    %c1 = arith.constant 1 : index
    %c0_11 = arith.constant 0 : index
    %c0_12 = arith.constant 0 : index
    %17 = vector.load %arg3[%c1, %c0_11, %c0_12] : memref<3x32x32xf32, #tpu.memory_space<vmem>>, vector<1x32x32xf32>
    %18 = vector.shape_cast %17 : vector<1x32x32xf32> to vector<32x32xf32>
    %19 = vector.extract_strided_slice %0 {offsets = [2, 0], sizes = [1, 32], strides = [1, 1]} : vector<5x32xf32> to vector<1x32xf32>
    %cst_13 = arith.constant dense<0.000000e+00> : vector<8x32xf32>
    %20 = tpu.matmul %16, %18, %cst_13 {dimension_numbers = #tpu.dot_dimension_numbers<[1], [0], [0], [1], [0, 0, 1, 1], [], []>} : vector<8x32xf32>, vector<32x32xf32>, vector<8x32xf32> -> vector<8x32xf32>
    %21 = vector.broadcast %19 : vector<1x32xf32> to vector<8x32xf32>
    %22 = arith.addf %20, %21 : vector<8x32xf32>
    %cst_14 = arith.constant 0.000000e+00 : f32
    %23 = vector.broadcast %cst_14 : f32 to vector<8x32xf32>
    %24 = arith.maximumf %22, %23 : vector<8x32xf32>
    %c2 = arith.constant 2 : index
    %c0_15 = arith.constant 0 : index
    %c0_16 = arith.constant 0 : index
    %25 = vector.load %arg3[%c2, %c0_15, %c0_16] : memref<3x32x32xf32, #tpu.memory_space<vmem>>, vector<1x32x32xf32>
    %26 = vector.shape_cast %25 : vector<1x32x32xf32> to vector<32x32xf32>
    %27 = vector.extract_strided_slice %0 {offsets = [3, 0], sizes = [1, 32], strides = [1, 1]} : vector<5x32xf32> to vector<1x32xf32>
    %cst_17 = arith.constant dense<0.000000e+00> : vector<8x32xf32>
    %28 = tpu.matmul %24, %26, %cst_17 {dimension_numbers = #tpu.dot_dimension_numbers<[1], [0], [0], [1], [0, 0, 1, 1], [], []>} : vector<8x32xf32>, vector<32x32xf32>, vector<8x32xf32> -> vector<8x32xf32>
    %29 = vector.broadcast %27 : vector<1x32xf32> to vector<8x32xf32>
    %30 = arith.addf %28, %29 : vector<8x32xf32>
    %cst_18 = arith.constant 0.000000e+00 : f32
    %31 = vector.broadcast %cst_18 : f32 to vector<8x32xf32>
    %32 = arith.maximumf %30, %31 : vector<8x32xf32>
    %33 = tpu.concatenate %8, %16, %24, %32 in 1 : vector<8x32xf32>, vector<8x32xf32>, vector<8x32xf32>, vector<8x32xf32> -> vector<8x128xf32>
    %c0_19 = arith.constant 0 : index
    %c0_20 = arith.constant 0 : index
    %34 = vector.load %arg7[%c0_19, %c0_20] : memref<8x128xf32, #tpu.memory_space<vmem>>, vector<8x128xf32>
    tpu.vector_store %arg7[%c0_19, %c0_20], %33 {strides = array<i32>} : memref<8x128xf32, #tpu.memory_space<vmem>>, vector<8x128xf32>,
    %c0_21 = arith.constant 0 : index
    %c0_22 = arith.constant 0 : index
    %35 = vector.load %arg4[%c0_21, %c0_22] : memref<32x8xf32, #tpu.memory_space<vmem>>, vector<32x8xf32>
    %cst_23 = arith.constant dense<0.000000e+00> : vector<8x8xf32>
    %36 = tpu.matmul %32, %35, %cst_23 {dimension_numbers = #tpu.dot_dimension_numbers<[1], [0], [0], [1], [0, 0, 1, 1], [], []>} : vector<8x32xf32>, vector<32x8xf32>, vector<8x8xf32> -> vector<8x8xf32>
    %37 = vector.extract_strided_slice %0 {offsets = [4, 0], sizes = [1, 8], strides = [1, 1]} : vector<5x32xf32> to vector<1x8xf32>
    %38 = vector.broadcast %37 : vector<1x8xf32> to vector<8x8xf32>
    %39 = arith.addf %36, %38 : vector<8x8xf32>
    %c0_24 = arith.constant 0 : index
    %c0_25 = arith.constant 0 : index
    %40 = vector.load %arg6[%c0_24, %c0_25] : memref<8x8xf32, #tpu.memory_space<vmem>>, vector<8x8xf32>
    tpu.vector_store %arg6[%c0_24, %c0_25], %39 {strides = array<i32>} : memref<8x8xf32, #tpu.memory_space<vmem>>, vector<8x8xf32>,
    return
  }
  func.func @transform_0(%arg0: i32) -> (i32, i32) {
    %c0_i32 = arith.constant 0 : i32
    %c0_i32_0 = arith.constant 0 : i32
    return %arg0, %c0_i32 : i32, i32
  }
  func.func @transform_1(%arg0: i32) -> (i32, i32) {
    %c0_i32 = arith.constant 0 : i32
    %c0_i32_0 = arith.constant 0 : i32
    %c0_i32_1 = arith.constant 0 : i32
    return %c0_i32, %c0_i32_0 : i32, i32
  }
  func.func @transform_2(%arg0: i32) -> (i32, i32, i32) {
    %c0_i32 = arith.constant 0 : i32
    %c0_i32_0 = arith.constant 0 : i32
    %c0_i32_1 = arith.constant 0 : i32
    %c0_i32_2 = arith.constant 0 : i32
    return %c0_i32, %c0_i32_0, %c0_i32_1 : i32, i32, i32
  }
  func.func @transform_3(%arg0: i32) -> (i32, i32) {
    %c0_i32 = arith.constant 0 : i32
    %c0_i32_0 = arith.constant 0 : i32
    %c0_i32_1 = arith.constant 0 : i32
    return %c0_i32, %c0_i32_0 : i32, i32
  }
  func.func @transform_4(%arg0: i32) -> (i32, i32) {
    %c0_i32 = arith.constant 0 : i32
    %c0_i32_0 = arith.constant 0 : i32
    %c0_i32_1 = arith.constant 0 : i32
    return %c0_i32, %c0_i32_0 : i32, i32
  }
  func.func @transform_5(%arg0: i32) -> (i32, i32) {
    %c0_i32 = arith.constant 0 : i32
    %c0_i32_0 = arith.constant 0 : i32
    return %arg0, %c0_i32 : i32, i32
  }
  func.func @transform_6(%arg0: i32) -> (i32, i32) {
    %c0_i32 = arith.constant 0 : i32
    %c0_i32_0 = arith.constant 0 : i32
    return %arg0, %c0_i32 : i32, i32
  }
}

</mosaic_0001>

<bundles_post_ra>
// kernel: tpu_custom_call.1
= control target key start
LH: loop header
LB: loop body
LE: loop exit
PB: predicated region body
PF: predicated region fallthrough
CT: control target
= control target key end

     0   :  { %12 = vsyncpa [#allocation3], 0  ;;  %s828_s0 = inlined_call_operand.vmem [shape: f32[8,16], index: 0, kind: input, shape index: {}]   ;;  %s829_s1 = inlined_call_operand.vmem [shape: f32[16,32], index: 1, kind: input, shape index: {}]   ;;  %s830_s2 = inlined_call_operand.hbm [shape: f32[3,32,32], index: 2, kind: input, shape index: {}]   ;;  %s831_s3 = inlined_call_operand.vmem [shape: f32[32,8], index: 3, kind: input, shape index: {}]   ;;  %s832_s4 = inlined_call_operand.vmem [shape: f32[5,32], index: 4, kind: input, shape index: {}]   ;;  %s833_s5 = inlined_call_operand.hbm [shape: f32[8,8], index: 5, kind: output, shape index: {0}]   ;;  %s834_s6 = inlined_call_operand.hbm [shape: f32[8,128], index: 6, kind: output, shape index: {1}]  }
   0x1   :  { %13 = vsyncpa [#allocation4], 0 }
   0x2   :  { %14 = vsyncpa [#allocation7], 0  ;;  %s686_s21 = smov [#allocation2]   ;;  %s614_s25 = scalar_lea.hbm %s830_s2, 1536 }
   0x3   :  { %s24_s22 = sshll.u32 %s686_s21, 4  ;;  %p615_p0 = scmp.ne.s32.totalorder %s830_s2, %s614_s25  ;;  %s25_s22 = int_to_ptr.vmem [resolvable:$true] %s24_s22 }
   0x4   :  { %p618_p1 = scmp.lt.u32.totalorder %s614_s25, %s830_s2 }
   0x6   :  { %p620_p2 = pnand %p618_p1, %p615_p0 }
   0x8   :  { %623 = shalt.err (!%p620_p2)
}
   0x9   :  { %s624_s30 = scalar_lea.vmem %s25_s22, 1536  ;;  %p629_p4 = scmp.lt.s32.totalorder %s25_s22, %s25_s22 }
   0xa   :  { %p625_p3 = scmp.ne.s32.totalorder %s25_s22, %s624_s30  ;;  %p630_p5 = scmp.lt.s32.totalorder %s624_s30, %s624_s30 }
   0xc   :  { %p631_p6 = por %p630_p5, %p629_p4 }
   0xe   :  { %p632_p7 = pnand %p631_p6, %p625_p3 }
  0x10   :  { %635 = shalt.err (!%p632_p7)
}
  0x11   :  { %s687_s7 = smov 128   ;;  %s688_s8 = smov 8  }
  0x12   :  { %30 = dma.hbm_to_vmem [thread:$0]  %s830_s2, 1536, %s25_s22, [#allocation3], %s687_s7, %s687_s7, %s688_s8  }
  0x13   :  { %680 = dma.done.wait [#allocation3], 1536  }
  0x14   :  { %681 = vsyncadd [#allocation3], 4294965760  ;;  %v689_v0 = vmov 0.0|0.0   ;;  %vm690_vm0 = vmmov 0   ;;  %v691_v1 = vmov 0.0   ;;  %v40_v2 = vld [vmem:[%s829_s1] sm:$0xff]  ;;  %v42_v15 = vlaneseq }
  0x15   :  { %576 = vmatprep.subr.bf16.mxu0 %v689_v0  ;;  %529 = vmatprep.mubr.msk.f32.mxu0 %vm690_vm0, %v691_v1  ;;  %v41_v3 = vld [vmem:[%s829_s1 + $0x8] sm:$0xff]  ;;  %v121_v5 = vld [vmem:[#allocation2] sm:$0xff]  ;;  %vm46_vm1 = vcmask 130048   ;;  %v123_v9 = vld [vmem:[#allocation2 + $0x10] sm:$0xff]  ;;  %vm129_vm2 = vcmask 261120   ;;  %s693_s20 = smov 64  }
  0x16   :  { %579 = vmatprep.subr.bf16.mxu1 %v689_v0  ;;  %540 = vmatprep.mubr.msk.f32.mxu1 %vm690_vm0, %v691_v1  ;;  %v577_v4 = vpack.c.bf16 %v41_v3, %v40_v2  ;;  %v122_v6 = vld [vmem:[#allocation2 + $0x8] sm:$0xff]  ;;  %v39_v8 = vld [vmem:[%s828_s0] sm:$0xff]  ;;  %v124_v10 = vld [vmem:[#allocation2 + $0x18] sm:$0xff]  ;;  %v762_v16 = vshrl.u32 %v42_v15, 7  ;;  %s694_s25 = smov 96   ;;  %vm381_vm3 = vcmask 523264  }
  0x17   :  { %v580_v7 = vpack.c.bf16 %v122_v6, %v121_v5  ;;  %v583_v11 = vpack.c.bf16 %v124_v10, %v123_v9  ;;  %v205_v12 = vld [vmem:[#allocation2 + $0x20] sm:$0xff]  ;;  %v206_v13 = vld [vmem:[#allocation2 + $0x28] sm:$0xff]  ;;  %v207_v24 = vld [vmem:[#allocation2 + $0x30] sm:$0xff]  ;;  %s695_s26 = smov [#allocation6]   ;;  %vm383_vm4 = vcmask 785408  }
  0x18   :  { %578 = vmatpush3.bf16.msra.mxu0 %v577_v4  ;;  %v586_v14 = vpack.c.bf16 %v206_v13, %v205_v12  ;;  %v44_v17 = vsub.s32 0, %v762_v16  ;;  %v768_v18 = vld [vmem:[%s832_s4] sm:$0x1f]  ;;  %v208_v25 = vld [vmem:[#allocation2 + $0x38] sm:$0xff]  ;;  %v289_v28 = vld [vmem:[#allocation2 + $0x48] sm:$0xff]  ;;  %v127_v29 = vsub.s32 1, %v762_v16 }
  0x19   :  { %581 = vmatpush3.bf16.msra.mxu1 %v580_v7  ;;  %585 = vmatprep.subr.bf16.mxu0 %v689_v0  ;;  %v589_v26 = vpack.c.bf16 %v208_v25, %v207_v24  ;;  %v288_v27 = vld [vmem:[#allocation2 + $0x40] sm:$0xff]  ;;  %s692_s4 = smov 32   ;;  %v290_v36 = vld [vmem:[#allocation2 + $0x50] sm:$0xff]  ;;  %v291_v37 = vld [vmem:[#allocation2 + $0x58] sm:$0xff]  ;;  %v211_v41 = vsub.s32 2, %v762_v16  ;;  %v294_v51 = vsub.s32 3, %v762_v16 }
  0x1a   :  { %582 = vmatprep.subr.bf16.mxu1 %v689_v0  ;;  %v45_v19 = vrot.slane %v768_v18, %v44_v17  ;;  %v592_v30 = vpack.c.bf16 %v289_v28, %v288_v27  ;;  %v128_v31 = vrot.slane %v768_v18, %v127_v29  ;;  %v595_v38 = vpack.c.bf16 %v291_v37, %v290_v36  ;;  %v386_v39 = vld [vmem:[%s831_s3] sm:$0xff]  ;;  %v387_v40 = vld [vmem:[%s831_s3 + $0x8] sm:$0xff]  ;;  %v388_v48 = vld [vmem:[%s831_s3 + $0x10] sm:$0xff]  ;;  %s484_s27 = sshll.u32 %s695_s26, 4  ;;  %s485_s27 = int_to_ptr.vmem [resolvable:$true] %s484_s27 }
  0x1b   :  { %530 = vmatmul.mubr.msk.f32.vlgmr.msra.gmra.mrb[0].mxu0 %vm46_vm1, %v39_v8  ;;  %v598_v42 = vpack.c.bf16 %v387_v40, %v386_v39  ;;  %v212_v43 = vrot.slane %v768_v18, %v211_v41  ;;  %v389_v49 = vld [vmem:[%s831_s3 + $0x18] sm:$0xff]  ;;  %v295_v52 = vrot.slane %v768_v18, %v294_v51  ;;  %s636_s3 = scalar_lea.vmem %s485_s27, 128  ;;  %p641_p9 = scmp.lt.s32.totalorder %s485_s27, %s485_s27 }
  0x1c   :  { %551 = vmatprep.mubr.msk.f32.mxu0 %vm690_vm0, %v691_v1  ;;  %587 = vmatpush3.bf16.msra.mxu0 %v586_v14  ;;  %v601_v50 = vpack.c.bf16 %v389_v49, %v388_v48  ;;  %p637_p8 = scmp.ne.s32.totalorder %s485_s27, %s636_s3  ;;  %p642_p10 = scmp.lt.s32.totalorder %s636_s3, %s636_s3 }
  0x1d   :  { %584 = vmatpush3.bf16.msra.mxu1 %v583_v11  ;;  %588 = vmatprep.subr.bf16.mxu0 %v689_v0 }
  0x1e   :  { %591 = vmatprep.subr.bf16.mxu1 %v689_v0  ;;  %p643_p11 = por %p642_p10, %p641_p9 }
  0x20   :  { %590 = vmatpush3.bf16.msra.mxu0 %v589_v26  ;;  %p644_p12 = pnand %p643_p11, %p637_p8 }
  0x21   :  { %597 = vmatprep.subr.bf16.mxu0 %v689_v0 }
  0xee   :  { %v116_v20 = vpop.f32.mrb[0].mxu0 }
  0xef   :  { %v771_v21 = vadd.f32 %v116_v20, %v45_v19  ;;  %v531_v22 = vpop.f32.mrb[1].mxu0 }
  0xf1   :  { %v120_v23 = vmax.f32 %v771_v21, 0.0 }
  0xf3   :  { %541 = vmatmul.mubr.msk.f32.vlgmr.msra.gmra.mrb[0].mxu1 %vm129_vm2, %v120_v23 }
  0xf4   :  { %562 = vmatprep.mubr.msk.f32.mxu1 %vm690_vm0, %v691_v1  ;;  %593 = vmatpush3.bf16.msra.mxu1 %v592_v30 }
  0xf5   :  { %594 = vmatprep.subr.bf16.mxu1 %v689_v0 }
  0xf8   :  { %596 = vmatpush3.bf16.msra.mxu1 %v595_v38 }
 0x1c6   :  { %v199_v32 = vpop.f32.mrb[0].mxu1 }
 0x1c7   :  { %v200_v33 = vadd.f32 %v199_v32, %v128_v31  ;;  %v542_v34 = vpop.f32.mrb[1].mxu1 }
 0x1c9   :  { %v203_v35 = vmax.f32 %v200_v33, 0.0 }
 0x1cb   :  { %370 = vrot.lane.b32.xlu0 %v203_v35, %s692_s4  ;;  %552 = vmatmul.mubr.msk.f32.vlgmr.msra.gmra.mrb[2].mxu0 %vm129_vm2, %v203_v35 }
 0x1cc   :  { %573 = vmatprep.mubr.msk.f32.mxu0 %vm690_vm0, %v691_v1  ;;  %599 = vmatpush3.bf16.msra.mxu0 %v598_v42 }
 0x1cd   :  { %600 = vmatprep.subr.bf16.mxu0 %v689_v0 }
 0x1d0   :  { %602 = vmatpush3.bf16.msra.mxu0 %v601_v50 }
 0x23d   :  { %v371_v57 = vpop.permute.xlu0 %370 }
 0x23e   :  { %v380_v59 = vsel %vm129_vm2, %v120_v23, %v371_v57 }
 0x29e   :  { %v282_v44 = vpop.f32.mrb[2].mxu0 }
 0x29f   :  { %v283_v45 = vadd.f32 %v282_v44, %v212_v43  ;;  %v553_v46 = vpop.f32.mrb[3].mxu0 }
 0x2a1   :  { %v286_v47 = vmax.f32 %v283_v45, 0.0 }
 0x2a3   :  { %373 = vrot.lane.b32.xlu0 %v286_v47, %s693_s20  ;;  %563 = vmatmul.mubr.msk.f32.vlgmr.msra.gmra.mrb[2].mxu1 %vm129_vm2, %v286_v47 }
 0x315   :  { %v374_v58 = vpop.permute.xlu0 %373 }
 0x316   :  { %v382_v60 = vsel %vm381_vm3, %v380_v59, %v374_v58 }
 0x376   :  { %v365_v53 = vpop.f32.mrb[2].mxu1 }
 0x377   :  { %v366_v54 = vadd.f32 %v365_v53, %v295_v52  ;;  %v564_v55 = vpop.f32.mrb[3].mxu1 }
 0x379   :  { %v369_v56 = vmax.f32 %v366_v54, 0.0 }
 0x37b   :  { %377 = vrot.lane.b32.xlu1 %v369_v56, %s694_s25  ;;  %574 = vmatmul.mubr.msk.f32.vlgmr.msra.gmra.mrb[4].mxu0 %vm129_vm2, %v369_v56 }
 0x3ed   :  { %v378_v61 = vpop.permute.xlu1 %377 }
 0x3ee   :  { %v384_v62 = vsel %vm383_vm4, %v382_v60, %v378_v61 }
 0x3ef   :  { %385 = vst [vmem:[#allocation6] sm:$0xff] %v384_v62 }
 0x3f0   :  { %647 = shalt.err (!%p644_p12)
}
 0x3f1   :  { %s648_s30 = scalar_lea.hbm %s834_s6, 128 }
 0x3f2   :  { %p649_p13 = scmp.ne.s32.totalorder %s834_s6, %s648_s30  ;;  %p652_p0 = scmp.lt.u32.totalorder %s648_s30, %s834_s6 }
 0x3f4   :  { %p654_p1 = pnand %p652_p0, %p649_p13 }
 0x3f6   :  { %657 = shalt.err (!%p654_p1)
}
 0x3f7   :  { %487 = dma.vmem_to_hbm [thread:$0]  %s485_s27, 128, %s834_s6, [#allocation7]   ;;  %v392_v63 = vsub.s32 4, %v762_v16  ;;  %vm466_vm5 = vcmask 64512  }
 0x3f8   :  { %s696_s13 = smov [#allocation5]  }
 0x3f9   :  { %v393_v0 = vrot.slane %v768_v18, %v392_v63  ;;  %s474_s14 = sshll.u32 %s696_s13, 4  ;;  %s475_s14 = int_to_ptr.vmem [resolvable:$true] %s474_s14 }
 0x3fa   :  { %s658_s2 = scalar_lea.vmem %s475_s14, 128  ;;  %p663_p3 = scmp.lt.s32.totalorder %s475_s14, %s475_s14 }
 0x3fb   :  { %p659_p2 = scmp.ne.s32.totalorder %s475_s14, %s658_s2  ;;  %p664_p4 = scmp.lt.s32.totalorder %s658_s2, %s658_s2 }
 0x3fd   :  { %p665_p5 = por %p664_p4, %p663_p3 }
 0x3ff   :  { %p666_p6 = pnand %p665_p5, %p659_p2 }
 0x44e   :  { %v462_v1 = vpop.f32.mrb[4].mxu0 }
 0x44f   :  { %v463_v2 = vadd.f32 %v462_v1, %v393_v0  ;;  %v575_v3 = vpop.f32.mrb[5].mxu0 }
 0x451   :  { %467 = vst.msk [vmem:[#allocation5] sm:$0xff] %vm466_vm5, %v463_v2 }
 0x452   :  { %669 = shalt.err (!%p666_p6)
}
 0x453   :  { %s670_s0 = scalar_lea.hbm %s833_s5, 128 }
 0x454   :  { %p671_p7 = scmp.ne.s32.totalorder %s833_s5, %s670_s0  ;;  %p674_p8 = scmp.lt.u32.totalorder %s670_s0, %s833_s5 }
 0x456   :  { %p676_p9 = pnand %p674_p8, %p671_p7 }
 0x458   :  { %679 = shalt.err (!%p676_p9)
}
 0x459   :  { %477 = dma.vmem_to_hbm [thread:$0]  %s475_s14, 128, %s833_s5, [#allocation4]  }
 0x45a   :  { %682 = dma.done.wait [#allocation4], 128  }
 0x45b   :  { %683 = vsyncadd [#allocation4], 4294967168 }
 0x45c   :  { %684 = dma.done.wait [#allocation7], 128  }
 0x45d   :  { %685 = vsyncadd [#allocation7], 4294967168 }
 0x45e   :  { %494 = vsyncpa [#allocation3], 1 }
 0x45f   :  { %495 = vsyncpa [#allocation4], 1 }
 0x460   :  { %496 = vsyncpa [#allocation7], 1 }

</bundles_post_ra>
